<compile_context>
chip_gen: v7x
topology: tpu7x:2x2x1
jax: 0.10.0
libtpu: 0.0.40
codegen_flags: <defaults>
</compile_context>

<pallas_src>
import numpy as np
import jax
import jax.numpy as jnp
from jax.experimental import pallas as pl
from jax.experimental.pallas import tpu as pltpu

# ---------------- small-shape configuration ----------------
B = 2            # batch
CIN = 3          # RGB channels (as in the torchvision backbone)
H = W = 16       # spatial size (B5 uses 456; small synthetic size here)
KH = KW = 3      # stem conv kernel
STRIDE = 2
PAD = 1
HO = (H + 2 * PAD - KH) // STRIDE + 1   # 8
WO = (W + 2 * PAD - KW) // STRIDE + 1   # 8
HW = HO * WO                            # 64 spatial positions per image
CSTEM = 32       # stem conv output channels (B5 stem is 48)
NUM_FTRS = 256   # stands in for the 1000-dim EfficientNet classifier output
KDIM = KH * KW * CIN                    # im2col contraction dim = 27
KPAD = 32        # contraction dim padded to a lane-friendly width
                 #   (column KDIM carries the folded stem bias "ones")
NHEAD = 5        # 1 (classification) + 4 (regression) head outputs
HEAD_PAD = 8     # fused head output width (zero padded)
TAIL_ROWS = CSTEM + 8                   # w_tail rows + bias row + pad (sublane mult of 8)


# ---------------- fused Pallas kernel ----------------
def fused_kernel(p_ref, w_stem_ref, tail_ref, out_ref):
    """Stem conv (im2col matmul, bias folded) + SiLU + per-image mean pool +
    folded classifier/heads tail, all in one grid point.

    p_ref      : (B*HW, KPAD)        flattened im2col patches; col KDIM == 1.0
    w_stem_ref : (KPAD, CSTEM)       stem weight with bias in row KDIM
    tail_ref   : (TAIL_ROWS, HEAD_PAD) rows [0:CSTEM] = w_cls @ w_heads,
                                       row CSTEM = folded bias, rest zeros
    out_ref    : (B, HEAD_PAD)       col 0 = motor_presence, cols 1:5 = bbox
    """
    # stem conv as one (B*HW, KPAD) @ (KPAD, CSTEM) matmul (bias via ones col)
    acc = jnp.dot(p_ref[...], w_stem_ref[...],
                  preferred_element_type=jnp.float32)
    acc = acc * jax.nn.sigmoid(acc)                       # SiLU on f32

    # per-image global average pool: sublane reduction, no pooling matrix
    pooled = jnp.sum(acc.reshape(B, HW, CSTEM), axis=1) * (1.0 / HW)  # (B, CSTEM)

    # folded classifier + heads tail: single tiny matmul + bias row
    w_tail = tail_ref[0:CSTEM, :]                         # (CSTEM, HEAD_PAD)
    b_tail = tail_ref[CSTEM:CSTEM + 1, :]                 # (1, HEAD_PAD)
    out_ref[...] = jnp.dot(pooled, w_tail,
                           preferred_element_type=jnp.float32) + b_tail


# ---------------- wrapper ----------------
def _im2col(x_nhwc):
    """Pure layout glue: extract 3x3/stride-2 patches (kh-major, kw, cin)."""
    xp = jnp.pad(x_nhwc, ((0, 0), (PAD, PAD), (PAD, PAD), (0, 0)))
    cols = []
    for kh in range(KH):
        for kw in range(KW):
            cols.append(xp[:, kh:kh + STRIDE * HO:STRIDE,
                           kw:kw + STRIDE * WO:STRIDE, :])
    patches = jnp.concatenate(cols, axis=-1)              # (B, HO, WO, KDIM)
    return patches.reshape(B, HW, KDIM)


@jax.jit
def bounding_box_model(x_nchw, params):
    # NCHW -> NHWC, then im2col (layout glue); all compute in the fused kernel.
    x = jnp.transpose(x_nchw, (0, 2, 3, 1)).astype(jnp.float32)
    patches = _im2col(x)                                           # (B, HW, KDIM)
    ones = jnp.ones((B, HW, 1), jnp.float32)                       # bias column
    zpad = jnp.zeros((B, HW, KPAD - KDIM - 1), jnp.float32)
    patches = jnp.concatenate([patches, ones, zpad], axis=-1)      # (B, HW, KPAD)
    patches = patches.reshape(B * HW, KPAD)                        # (128, 32)

    vmem_spec = pl.BlockSpec(memory_space=pltpu.MemorySpace.VMEM)
    out = pl.pallas_call(
        fused_kernel,
        out_shape=jax.ShapeDtypeStruct((B, HEAD_PAD), jnp.float32),
        in_specs=[vmem_spec, vmem_spec, vmem_spec],
        out_specs=vmem_spec,
    )(patches, params["w_stem_aug"], params["tail_packed"])

    motor_presence = out[:, 0:1]      # (B, 1)
    bbox_params = out[:, 1:1 + 4]     # (B, 4)
    return motor_presence, bbox_params


def init_params(key):
    ks = jax.random.split(key, 5)
    s = 0.05
    hp = jax.lax.Precision.HIGHEST

    # ----- reference (unfused) parameters -----
    w_stem = s * jax.random.normal(ks[0], (KH, KW, CIN, CSTEM), jnp.float32)
    w_stem2d = w_stem.reshape(KDIM, CSTEM)      # (kh, kw, cin) matches _im2col
    b_stem = 0.02 * jax.random.normal(ks[1], (CSTEM,), jnp.float32)
    w_cls = s * jax.random.normal(ks[2], (CSTEM, NUM_FTRS), jnp.float32)
    b_cls = 0.01 * jnp.ones((NUM_FTRS,), jnp.float32)
    w_head_c = s * jax.random.normal(ks[3], (NUM_FTRS, 1), jnp.float32)
    b_head_c = jnp.zeros((1,), jnp.float32)
    w_head_r = s * jax.random.normal(ks[4], (NUM_FTRS, 4), jnp.float32)
    b_head_r = jnp.zeros((4,), jnp.float32)

    # ----- kernel-side packed / folded parameters -----
    # stem: bias folded via the ones column at index KDIM of the padded patches
    w_stem_aug = jnp.zeros((KPAD, CSTEM), jnp.float32)
    w_stem_aug = w_stem_aug.at[:KDIM].set(w_stem2d)
    w_stem_aug = w_stem_aug.at[KDIM].set(b_stem)

    # tail: classifier @ heads folded (exact — no nonlinearity between them)
    w_heads = jnp.concatenate(
        [w_head_c, w_head_r,
         jnp.zeros((NUM_FTRS, HEAD_PAD - NHEAD), jnp.float32)], axis=1)   # (NF, 8)
    b_heads = jnp.concatenate(
        [b_head_c, b_head_r, jnp.zeros((HEAD_PAD - NHEAD,), jnp.float32)])  # (8,)
    w_tail = jnp.dot(w_cls, w_heads, precision=hp)                          # (CSTEM, 8)
    b_tail = jnp.dot(b_cls[None, :], w_heads, precision=hp) + b_heads[None, :]
    tail_packed = jnp.zeros((TAIL_ROWS, HEAD_PAD), jnp.float32)
    tail_packed = tail_packed.at[:CSTEM].set(w_tail)
    tail_packed = tail_packed.at[CSTEM].set(b_tail[0])

    return {
        # reference params
        "w_stem2d": w_stem2d, "b_stem": b_stem,
        "w_cls": w_cls, "b_cls": b_cls,
        "w_head_c": w_head_c, "b_head_c": b_head_c,
        "w_head_r": w_head_r, "b_head_r": b_head_r,
        # kernel params (3 operands total)
        "w_stem_aug": w_stem_aug,
        "tail_packed": tail_packed,
    }


def reference_forward(x_nchw, params):
    """Pure-JAX, unfused reference for numerical sanity check."""
    hp = jax.lax.Precision.HIGHEST
    x = jnp.transpose(x_nchw, (0, 2, 3, 1)).astype(jnp.float32)
    patches = _im2col(x)
    acc = jnp.einsum("bpk,kc->bpc", patches, params["w_stem2d"], precision=hp)
    acc = acc + params["b_stem"][None, None, :]
    acc = acc * jax.nn.sigmoid(acc)
    pooled = jnp.mean(acc, axis=1)
    feats = jnp.dot(pooled, params["w_cls"], precision=hp) + params["b_cls"][None, :]
    cls = jnp.dot(feats, params["w_head_c"], precision=hp) + params["b_head_c"][None, :]
    box = jnp.dot(feats, params["w_head_r"], precision=hp) + params["b_head_r"][None, :]
    return cls, box


if __name__ == "__main__":
    key = jax.random.PRNGKey(0)
    k_x, k_p = jax.random.split(key)
    x = jax.random.normal(k_x, (B, CIN, H, W), jnp.float32)   # NCHW like PyTorch
    params = init_params(k_p)

    motor_presence, bbox_params = bounding_box_model(x, params)
    jax.block_until_ready((motor_presence, bbox_params))

    assert motor_presence.shape == (B, 1)
    assert bbox_params.shape == (B, 4)

    ref_cls, ref_box = reference_forward(x, params)
    np.testing.assert_allclose(np.asarray(motor_presence), np.asarray(ref_cls),
                               rtol=1e-2, atol=1e-2)
    np.testing.assert_allclose(np.asarray(bbox_params), np.asarray(ref_box),
                               rtol=1e-2, atol=1e-2)

    print("KERNEL_OK")
</pallas_src>

<mosaic_0001>
module attributes {stable_mosaic.version = 11 : i64} {
  func.func @fused_kernel(%arg0: memref<128x32xf32, #tpu.memory_space<vmem>>, %arg1: memref<32x32xf32, #tpu.memory_space<vmem>>, %arg2: memref<40x8xf32, #tpu.memory_space<vmem>>, %arg3: memref<2x8xf32, #tpu.memory_space<vmem>>) attributes {dimension_semantics = [], scalar_prefetch = 0 : i64, scratch_operands = 0 : i64, tpu.core_type = #tpu.core_type<tc>} {
    %c0 = arith.constant 0 : index
    %c0_0 = arith.constant 0 : index
    %0 = vector.load %arg0[%c0, %c0_0] : memref<128x32xf32, #tpu.memory_space<vmem>>, vector<128x32xf32>
    %c0_1 = arith.constant 0 : index
    %c0_2 = arith.constant 0 : index
    %1 = vector.load %arg1[%c0_1, %c0_2] : memref<32x32xf32, #tpu.memory_space<vmem>>, vector<32x32xf32>
    %cst = arith.constant dense<0.000000e+00> : vector<128x32xf32>
    %2 = tpu.matmul %0, %1, %cst {dimension_numbers = #tpu.dot_dimension_numbers<[1], [0], [0], [1], [0, 0, 1, 1], [], []>} : vector<128x32xf32>, vector<32x32xf32>, vector<128x32xf32> -> vector<128x32xf32>
    %3 = arith.negf %2 : vector<128x32xf32>
    %4 = math.exp %3 : vector<128x32xf32>
    %cst_3 = arith.constant 1.000000e+00 : f32
    %5 = vector.broadcast %cst_3 : f32 to vector<128x32xf32>
    %6 = arith.addf %5, %4 : vector<128x32xf32>
    %7 = arith.divf %5, %6 : vector<128x32xf32>
    %8 = arith.mulf %2, %7 : vector<128x32xf32>
    %9 = vector.shape_cast %8 : vector<128x32xf32> to vector<2x64x32xf32>
    %cst_4 = arith.constant dense<0.000000e+00> : vector<2x32xf32>
    %10 = vector.multi_reduction <add>, %9, %cst_4 [1] : vector<2x64x32xf32> to vector<2x32xf32>
    %cst_5 = arith.constant 1.562500e-02 : f32
    %11 = vector.broadcast %cst_5 : f32 to vector<2x32xf32>
    %12 = arith.mulf %10, %11 : vector<2x32xf32>
    %c0_6 = arith.constant 0 : index
    %c0_7 = arith.constant 0 : index
    %13 = vector.load %arg2[%c0_6, %c0_7] : memref<40x8xf32, #tpu.memory_space<vmem>>, vector<32x8xf32>
    %c32 = arith.constant 32 : index
    %c0_8 = arith.constant 0 : index
    %14 = vector.load %arg2[%c32, %c0_8] : memref<40x8xf32, #tpu.memory_space<vmem>>, vector<1x8xf32>
    %cst_9 = arith.constant dense<0.000000e+00> : vector<2x8xf32>
    %15 = tpu.matmul %12, %13, %cst_9 {dimension_numbers = #tpu.dot_dimension_numbers<[1], [0], [0], [1], [0, 0, 1, 1], [], []>} : vector<2x32xf32>, vector<32x8xf32>, vector<2x8xf32> -> vector<2x8xf32>
    %16 = vector.broadcast %14 : vector<1x8xf32> to vector<2x8xf32>
    %17 = arith.addf %15, %16 : vector<2x8xf32>
    %c0_10 = arith.constant 0 : index
    %c0_11 = arith.constant 0 : index
    %18 = vector.load %arg3[%c0_10, %c0_11] : memref<2x8xf32, #tpu.memory_space<vmem>>, vector<2x8xf32>
    tpu.vector_store %arg3[%c0_10, %c0_11], %17 {strides = array<i32>} : memref<2x8xf32, #tpu.memory_space<vmem>>, vector<2x8xf32>,
    return
  }
}

</mosaic_0001>

<bundles_post_ra>
// kernel: bounding_box_model.1
= control target key start
LH: loop header
LB: loop body
LE: loop exit
PB: predicated region body
PF: predicated region fallthrough
CT: control target
= control target key end

     0   :  { %vm34_vm0 = vcmask 261120   ;;  %v662_v22 = vmov 0.0|0.0   ;;  %vm663_vm1 = vmmov 0   ;;  %v664_v26 = vmov 0.0   ;;  %s852_s1 = inlined_call_operand.vmem [shape: f32[32,32], index: 1, kind: input, shape index: {}]   ;;  %s853_s0 = inlined_call_operand.vmem [shape: f32[128,32], index: 0, kind: input, shape index: {}]   ;;  %s854_s2 = inlined_call_operand.vmem [shape: f32[40,8], index: 2, kind: input, shape index: {}]   ;;  %s855_s3 = inlined_call_operand.vmem [shape: f32[2,8], index: 3, kind: output, shape index: {}]  }
   0x1   :  { %v30_v0 = vld [vmem:[%s852_s1] sm:$0xff]  ;;  %v31_v1 = vld [vmem:[%s852_s1 + $0x8] sm:$0xff]  ;;  %v32_v2 = vld [vmem:[%s852_s1 + $0x10] sm:$0xff]  ;;  %vm395_vm2 = vcmask 1041409   ;;  %vm469_vm3 = vcmask 58368  }
   0x2   :  { %v577_v3 = vpack.c.bf16 %v31_v1, %v30_v0  ;;  %v33_v4 = vld [vmem:[%s852_s1 + $0x18] sm:$0xff]  ;;  %v14_v5 = vld [vmem:[%s853_s0] sm:$0xff]  ;;  %v24_v6 = vld [vmem:[%s853_s0 + $0x50] sm:$0xff] }
   0x3   :  { %v581_v7 = vpack.c.bf16 %v33_v4, %v32_v2  ;;  %542 = vmatprep.mubr.msk.f32.mxu0 %vm34_vm0, %v14_v5  ;;  %557 = vmatprep.mubr.msk.f32.mxu1 %vm34_vm0, %v24_v6  ;;  %v15_v8 = vld [vmem:[%s853_s0 + $0x8] sm:$0xff]  ;;  %v25_v9 = vld [vmem:[%s853_s0 + $0x58] sm:$0xff]  ;;  %v16_v10 = vld [vmem:[%s853_s0 + $0x10] sm:$0xff] }
   0x4   :  { %578 = vmatprep.subr.bf16.mxu0 %v577_v3  ;;  %591 = vmatprep.subr.bf16.mxu1 %v577_v3  ;;  %v26_v11 = vld [vmem:[%s853_s0 + $0x60] sm:$0xff]  ;;  %v17_v12 = vld [vmem:[%s853_s0 + $0x18] sm:$0xff]  ;;  %v27_v13 = vld [vmem:[%s853_s0 + $0x68] sm:$0xff] }
   0x5   :  { %580 = vmatpush3.bf16.msra.mxu0 %v577_v3  ;;  %593 = vmatpush3.bf16.msra.mxu1 %v577_v3  ;;  %v18_v14 = vld [vmem:[%s853_s0 + $0x20] sm:$0xff]  ;;  %v28_v15 = vld [vmem:[%s853_s0 + $0x70] sm:$0xff]  ;;  %v19_v16 = vld [vmem:[%s853_s0 + $0x28] sm:$0xff] }
   0x6   :  { %582 = vmatprep.subr.bf16.mxu0 %v581_v7  ;;  %592 = vmatprep.subr.bf16.mxu1 %v581_v7  ;;  %v29_v17 = vld [vmem:[%s853_s0 + $0x78] sm:$0xff]  ;;  %v20_v18 = vld [vmem:[%s853_s0 + $0x30] sm:$0xff]  ;;  %v22_v20 = vld [vmem:[%s853_s0 + $0x40] sm:$0xff] }
   0x7   :  { %v21_v19 = vld [vmem:[%s853_s0 + $0x38] sm:$0xff]  ;;  %v23_v21 = vld [vmem:[%s853_s0 + $0x48] sm:$0xff]  ;;  %v384_v23 = vld [vmem:[%s854_s2] sm:$0xff] }
   0x8   :  { %v385_v24 = vld [vmem:[%s854_s2 + $0x8] sm:$0xff]  ;;  %v386_v25 = vld [vmem:[%s854_s2 + $0x10] sm:$0xff]  ;;  %v387_v28 = vld [vmem:[%s854_s2 + $0x18] sm:$0xff] }
   0x9   :  { %584 = vmatpush3.bf16.msra.mxu0 %v581_v7  ;;  %594 = vmatpush3.bf16.msra.mxu1 %v581_v7  ;;  %v586_v27 = vpack.c.bf16 %v385_v24, %v384_v23  ;;  %v589_v29 = vpack.c.bf16 %v387_v28, %v386_v25 }
   0xa   :  { %585 = vmatprep.subr.bf16.mxu1 %v662_v22 }
   0xc   :  { %543 = vmatmul.mubr.msk.f32.vlgmr.msra.gmra.mrb[0].mxu0 %vm34_vm0, %v15_v8  ;;  %558 = vmatmul.mubr.msk.f32.vlgmr.msra.gmra.mrb[0].mxu1 %vm34_vm0, %v25_v9 }
   0xd   :  { %545 = vmatprep.mubr.msk.f32.mxu0 %vm34_vm0, %v16_v10  ;;  %560 = vmatprep.mubr.msk.f32.mxu1 %vm34_vm0, %v26_v11 }
   0xe   :  { %587 = vmatpush3.bf16.msra.mxu1 %v586_v27 }
   0xf   :  { %588 = vmatprep.subr.bf16.mxu1 %v662_v22 }
  0x10   :  { %546 = vmatmul.mubr.msk.f32.gmra.mrb[2].mxu0 %vm34_vm0, %v17_v12  ;;  %561 = vmatmul.mubr.msk.f32.gmra.mrb[2].mxu1 %vm34_vm0, %v27_v13 }
  0x11   :  { %548 = vmatprep.mubr.msk.f32.mxu0 %vm34_vm0, %v18_v14  ;;  %563 = vmatprep.mubr.msk.f32.mxu1 %vm34_vm0, %v28_v15 }
  0x12   :  { %590 = vmatpush3.bf16.msra.mxu1 %v589_v29 }
  0x14   :  { %549 = vmatmul.mubr.msk.f32.gmra.mrb[4].mxu0 %vm34_vm0, %v19_v16  ;;  %564 = vmatmul.mubr.msk.f32.gmra.mrb[4].mxu1 %vm34_vm0, %v29_v17 }
  0x15   :  { %551 = vmatprep.mubr.msk.f32.mxu0 %vm34_vm0, %v20_v18  ;;  %574 = vmatprep.mubr.msk.f32.mxu1 %vm663_vm1, %v664_v26 }
  0x18   :  { %552 = vmatmul.mubr.msk.f32.gmra.mrb[6].mxu0 %vm34_vm0, %v21_v19 }
  0x19   :  { %554 = vmatprep.mubr.msk.f32.mxu0 %vm34_vm0, %v22_v20 }
  0x1c   :  { %555 = vmatmul.mubr.msk.f32.gmra.mrb[8].mxu0 %vm34_vm0, %v23_v21 }
  0xdf   :  { %v544_v30 = vpop.f32.mrb[0].mxu0  ;;  %v773_v31 = vpop.f32.mrb[0].mxu1 }
  0xe0   :  { %v492_v32 = vmul.f32 -1.442695, %v544_v30  ;;  %v149_v33 = vpop.f32.mrb[1].mxu0  ;;  %v775_v34 = vpop.f32.mrb[1].mxu1  ;;  %v502_v53 = vmul.f32 -1.442695, %v773_v31 }
  0xe1   :  { %v491_v35 = vmul.f32 -1.442695, %v149_v33  ;;  %v501_v57 = vmul.f32 -1.442695, %v775_v34 }
  0xe2   :  { %598 = vpow2.f32 %v492_v32 }
  0xe3   :  { %v777_v36 = vpop.f32.mrb[2].mxu0  ;;  %v779_v37 = vpop.f32.mrb[2].mxu1  ;;  %600 = vpow2.f32 %v491_v35 }
  0xe4   :  { %v494_v38 = vmul.f32 -1.442695, %v777_v36  ;;  %v782_v39 = vpop.f32.mrb[3].mxu0  ;;  %v784_v40 = vpop.f32.mrb[3].mxu1  ;;  %v504_v2 = vmul.f32 -1.442695, %v779_v37 }
  0xe5   :  { %v493_v41 = vmul.f32 -1.442695, %v782_v39  ;;  %v503_v3 = vmul.f32 -1.442695, %v784_v40 }
  0xe6   :  { %602 = vpow2.f32 %v494_v38 }
  0xe7   :  { %v787_v42 = vpop.f32.mrb[4].mxu0  ;;  %v789_v43 = vpop.f32.mrb[4].mxu1  ;;  %604 = vpow2.f32 %v493_v41 }
  0xe8   :  { %v496_v44 = vmul.f32 -1.442695, %v787_v42  ;;  %v792_v45 = vpop.f32.mrb[5].mxu0  ;;  %v794_v46 = vpop.f32.mrb[5].mxu1  ;;  %v506_v18 = vmul.f32 -1.442695, %v789_v43 }
  0xe9   :  { %v495_v47 = vmul.f32 -1.442695, %v792_v45  ;;  %v505_v14 = vmul.f32 -1.442695, %v794_v46 }
  0xea   :  { %606 = vpow2.f32 %v496_v44 }
  0xeb   :  { %v797_v48 = vpop.f32.mrb[6].mxu0  ;;  %608 = vpow2.f32 %v495_v47 }
  0xec   :  { %v599_v49 = vpop.eup %598  ;;  %v799_v50 = vpop.f32.mrb[7].mxu0  ;;  %v498_v61 = vmul.f32 -1.442695, %v797_v48 }
  0xed   :  { %v277_v51 = vadd.f32 1.0, %v599_v49  ;;  %v601_v52 = vpop.eup %600  ;;  %v497_v5 = vmul.f32 -1.442695, %v799_v50 }
  0xee   :  { %v276_v54 = vadd.f32 1.0, %v601_v52 }
  0xef   :  { %610 = vrcp.f32 %v277_v51  ;;  %v802_v55 = vpop.f32.mrb[8].mxu0 }
  0xf0   :  { %v603_v56 = vpop.eup %602  ;;  %v805_v58 = vpop.f32.mrb[9].mxu0  ;;  %612 = vrcp.f32 %v276_v54  ;;  %v500_v7 = vmul.f32 -1.442695, %v802_v55 }
  0xf1   :  { %v279_v59 = vadd.f32 1.0, %v603_v56  ;;  %v605_v60 = vpop.eup %604  ;;  %614 = vpow2.f32 %v502_v53  ;;  %v499_v9 = vmul.f32 -1.442695, %v805_v58 }
  0xf2   :  { %v278_v62 = vadd.f32 1.0, %v605_v60 }
  0xf3   :  { %616 = vrcp.f32 %v279_v59 }
  0xf4   :  { %v607_v63 = vpop.eup %606  ;;  %618 = vpow2.f32 %v501_v57 }
  0xf5   :  { %620 = vrcp.f32 %v278_v62  ;;  %v281_v0 = vadd.f32 1.0, %v607_v63  ;;  %v609_v1 = vpop.eup %608 }
  0xf6   :  { %622 = vpow2.f32 %v498_v61  ;;  %v280_v4 = vadd.f32 1.0, %v609_v1 }
  0xf7   :  { %624 = vrcp.f32 %v281_v0 }
  0xf8   :  { %626 = vrcp.f32 %v280_v4 }
  0xf9   :  { %v611_v6 = vpop.eup %610  ;;  %628 = vpow2.f32 %v504_v2 }
  0xfa   :  { %v325_v8 = vmul.f32 %v611_v6, %v544_v30  ;;  %v613_v10 = vpop.eup %612  ;;  %630 = vpow2.f32 %v503_v3 }
  0xfb   :  { %v615_v11 = vpop.eup %614  ;;  %v324_v13 = vmul.f32 %v613_v10, %v149_v33  ;;  %632 = vpow2.f32 %v497_v5 }
  0xfc   :  { %v341_v12 = vsel %vm34_vm0, %v325_v8, 0.0  ;;  %634 = vpow2.f32 %v500_v7  ;;  %v287_v25 = vadd.f32 1.0, %v615_v11 }
  0xfd   :  { %v617_v15 = vpop.eup %616  ;;  %v340_v17 = vsel %vm34_vm0, %v324_v13, 0.0  ;;  %636 = vpow2.f32 %v499_v9 }
  0xfe   :  { %v619_v16 = vpop.eup %618  ;;  %v342_v20 = vadd.f32 %v341_v12, %v340_v17  ;;  %v327_v22 = vmul.f32 %v617_v15, %v777_v36  ;;  %638 = vpow2.f32 %v505_v14 }
  0xff   :  { %v621_v19 = vpop.eup %620  ;;  %640 = vpow2.f32 %v506_v18  ;;  %v286_v32 = vadd.f32 1.0, %v619_v16 }
 0x100   :  { %v623_v21 = vpop.eup %622  ;;  %v326_v23 = vmul.f32 %v621_v19, %v782_v39  ;;  %v345_v33 = vsel %vm34_vm0, %v327_v22, 0.0  ;;  %642 = vrcp.f32 %v287_v25 }
 0x101   :  { %v625_v24 = vpop.eup %624  ;;  %v283_v29 = vadd.f32 1.0, %v623_v21 }
 0x102   :  { %v343_v26 = vsel %vm34_vm0, %v326_v23, 0.0  ;;  %v627_v27 = vpop.eup %626  ;;  %v329_v35 = vmul.f32 %v625_v24, %v787_v42 }
 0x103   :  { %v344_v28 = vadd.f32 %v343_v26, %v342_v20  ;;  %v629_v30 = vpop.eup %628  ;;  %v328_v38 = vmul.f32 %v627_v27, %v792_v45  ;;  %644 = vrcp.f32 %v283_v29 }
 0x104   :  { %v631_v36 = vpop.eup %630  ;;  %646 = vrcp.f32 %v286_v32  ;;  %v349_v53 = vsel %vm34_vm0, %v329_v35, 0.0  ;;  %v289_v59 = vadd.f32 1.0, %v629_v30 }
 0x105   :  { %v346_v41 = vadd.f32 %v345_v33, %v344_v28  ;;  %v633_v39 = vpop.eup %632  ;;  %v347_v44 = vsel %vm34_vm0, %v328_v38, 0.0  ;;  %v288_v56 = vadd.f32 1.0, %v631_v36 }
 0x106   :  { %v635_v47 = vpop.eup %634  ;;  %v282_v51 = vadd.f32 1.0, %v633_v39 }
 0x107   :  { %v348_v49 = vadd.f32 %v347_v44, %v346_v41  ;;  %v637_v52 = vpop.eup %636  ;;  %v285_v54 = vadd.f32 1.0, %v635_v47 }
 0x108   :  { %648 = vrcp.f32 %v282_v51  ;;  %v284_v57 = vadd.f32 1.0, %v637_v52  ;;  %v639_v45 = vpop.eup %638 }
 0x109   :  { %v350_v42 = vadd.f32 %v349_v53, %v348_v49  ;;  %650 = vrcp.f32 %v285_v54  ;;  %v641_v60 = vpop.eup %640  ;;  %v290_v61 = vadd.f32 1.0, %v639_v45  ;;  %v507_v53 = vld [vmem:[%s854_s2 + $0x20] ss:$0 sm:$0xff] }
 0x10a   :  { %652 = vrcp.f32 %v284_v57  ;;  %v291_v62 = vadd.f32 1.0, %v641_v60  ;;  %v643_v63 = vpop.eup %642 }
 0x10b   :  { %654 = vrcp.f32 %v288_v56  ;;  %v335_v14 = vmul.f32 %v643_v63, %v773_v31 }
 0x10c   :  { %656 = vrcp.f32 %v289_v59 }
 0x10d   :  { %v645_v0 = vpop.eup %644  ;;  %658 = vrcp.f32 %v290_v61  ;;  %v366_v20 = vsel %vm34_vm0, %v335_v14, 0.0 }
 0x10e   :  { %v647_v1 = vpop.eup %646  ;;  %660 = vrcp.f32 %v291_v62  ;;  %v331_v4 = vmul.f32 %v645_v0, %v797_v48 }
 0x10f   :  { %v334_v8 = vmul.f32 %v647_v1, %v775_v34 }
 0x110   :  { %v353_v15 = vsel %vm34_vm0, %v331_v4, 0.0 }
 0x112   :  { %v649_v2 = vpop.eup %648 }
 0x113   :  { %v651_v3 = vpop.eup %650  ;;  %v330_v5 = vmul.f32 %v649_v2, %v799_v50 }
 0x114   :  { %v653_v6 = vpop.eup %652  ;;  %v333_v7 = vmul.f32 %v651_v3, %v802_v55  ;;  %v364_v55 = vsel %vm34_vm0, %v334_v8, 0.0 }
 0x115   :  { %v351_v9 = vsel %vm34_vm0, %v330_v5, 0.0  ;;  %v332_v10 = vmul.f32 %v653_v6, %v805_v58  ;;  %v655_v11 = vpop.eup %654 }
 0x116   :  { %v352_v12 = vadd.f32 %v351_v9, %v350_v42  ;;  %v362_v13 = vsel %vm34_vm0, %v333_v7, 0.0  ;;  %v657_v50 = vpop.eup %656  ;;  %v336_v34 = vmul.f32 %v655_v11, %v784_v40 }
 0x117   :  { %v361_v48 = vsel %vm34_vm0, %v332_v10, 0.0  ;;  %v659_v18 = vpop.eup %658  ;;  %v337_v21 = vmul.f32 %v657_v50, %v779_v37 }
 0x118   :  { %v354_v16 = vadd.f32 %v353_v15, %v352_v12  ;;  %v363_v17 = vadd.f32 %v362_v13, %v361_v48  ;;  %v661_v22 = vpop.eup %660  ;;  %v368_v23 = vsel %vm34_vm0, %v336_v34, 0.0  ;;  %v338_v24 = vmul.f32 %v659_v18, %v794_v46 }
 0x119   :  { %v370_v27 = vsel %vm34_vm0, %v337_v21, 0.0  ;;  %v339_v28 = vmul.f32 %v661_v22, %v789_v43 }
 0x11a   :  { %v355_v19 = vrot.slane %v354_v16, 4  ;;  %v365_v58 = vadd.f32 %v364_v55, %v363_v17  ;;  %v372_v29 = vsel %vm34_vm0, %v338_v24, 0.0 }
 0x11b   :  { %v374_v33 = vsel %vm34_vm0, %v339_v28, 0.0 }
 0x11c   :  { %v367_v31 = vadd.f32 %v366_v20, %v365_v58  ;;  %v356_v25 = vadd.f32 %v355_v19, %v354_v16 }
 0x11e   :  { %v369_v26 = vadd.f32 %v368_v23, %v367_v31  ;;  %v357_v30 = vrot.slane %v356_v25, 2 }
 0x120   :  { %v371_v40 = vadd.f32 %v370_v27, %v369_v26  ;;  %v358_v35 = vadd.f32 %v357_v30, %v356_v25 }
 0x122   :  { %v373_v32 = vadd.f32 %v372_v29, %v371_v40  ;;  %v359_v41 = vrot.slane %v358_v35, 1 }
 0x124   :  { %v375_v37 = vadd.f32 %v374_v33, %v373_v32  ;;  %v360_v44 = vadd.f32 %v359_v41, %v358_v35 }
 0x126   :  { %v376_v38 = vrot.slane %v375_v37, 4  ;;  %v382_v51 = vmul.f32 0.015625, %v360_v44 }
 0x128   :  { %v377_v36 = vadd.f32 %v376_v38, %v375_v37 }
 0x12a   :  { %v378_v39 = vrot.slane %v377_v36, 2 }
 0x12c   :  { %v379_v46 = vadd.f32 %v378_v39, %v377_v36 }
 0x12e   :  { %v380_v47 = vrot.slane %v379_v46, 1 }
 0x130   :  { %v381_v49 = vadd.f32 %v380_v47, %v379_v46 }
 0x132   :  { %v383_v43 = vmul.f32 0.015625, %v381_v49 }
 0x134   :  { %v396_v52 = vsel %vm395_vm2, %v383_v43, %v382_v51 }
 0x135   :  { %575 = vmatmul.mubr.msk.f32.vlgmr.msra.gmra.mrb[6].mxu1 %vm34_vm0, %v396_v52 }
 0x208   :  { %v465_v54 = vpop.f32.mrb[6].mxu1 }
 0x209   :  { %v466_v56 = vadd.f32 %v507_v53, %v465_v54  ;;  %v576_v42 = vpop.f32.mrb[7].mxu1 }
 0x20b   :  { %470 = vst.msk [vmem:[%s855_s3] sm:$0x3] %vm469_vm3, %v466_v56 }

</bundles_post_ra>
